<compile_context>
chip_gen: v5e
topology: v5e:2x2
jax: 0.10.0
libtpu: 0.0.40
codegen_flags: <defaults>
</compile_context>

<pallas_src>
import functools

import jax
import jax.numpy as jnp
from jax.experimental import pallas as pl
from jax.experimental.pallas import tpu as pltpu

NUM_AGENTS = 5
IN_FEATURES = (NUM_AGENTS + 1) * 2   # 12
HIDDEN = 64
OUT_FEATURES = 5                     # len(directions)
LANE = 128                           # vreg lane width


def _round_up(n: int, m: int) -> int:
    return ((n + m - 1) // m) * m


def mlp_kernel(x_ref, w1_ref, b1_ref, w2_ref, b2_ref, o_ref):
    """Fused MLP tile, native batch-major layout.

    x_ref : (TB, IN_FEATURES)       f32
    w1_ref: (IN_FEATURES, HIDDEN)   f32   (resident)
    b1_ref: (1, HIDDEN)             f32   (resident)
    w2_ref: (HIDDEN, OUT_FEATURES)  f32   (resident)
    b2_ref: (1, OUT_FEATURES)       f32   (resident)
    o_ref : (TB, OUT_FEATURES)      f32
    """
    # h = tanh(x @ W1 + b1): MXU matmul (f32 accumulate), bias + tanh on VPU/EUP.
    h = jnp.dot(x_ref[...], w1_ref[...], preferred_element_type=jnp.float32)
    h = jnp.tanh(h + b1_ref[...])                              # (TB, HIDDEN) f32
    # q = h @ W2 + b2: second MXU pass, stored directly in the output layout.
    q = jnp.dot(h, w2_ref[...], preferred_element_type=jnp.float32)
    o_ref[...] = q + b2_ref[...]                               # (TB, OUT_FEATURES)


@functools.partial(jax.jit, static_argnames=("block_b",))
def network_forward(x, w1, b1, w2, b2, *, block_b=4096):
    """Forward pass of `Network` as one fused Pallas call. x: (B, 12) f32 -> (B, 5) f32."""
    B = x.shape[0]

    # Equal-sized, 128-aligned batch tiles; number of tiles chosen so padding waste
    # stays small.  Force >= 2 grid steps when there is enough work so both of
    # v7x's TensorCores receive tiles via the "parallel" batch axis.
    grid_n = max(-(-B // block_b), 1)
    if B >= 2 * LANE:
        grid_n = max(grid_n, 2)
    tb = _round_up(-(-B // grid_n), LANE)
    b_pad = grid_n * tb

    xp = x if b_pad == B else jnp.pad(x, ((0, b_pad - B), (0, 0)))
    b1c = b1.reshape(1, HIDDEN).astype(jnp.float32)
    b2c = b2.reshape(1, OUT_FEATURES).astype(jnp.float32)

    const = lambda shape: pl.BlockSpec(shape, lambda i: (0, 0))   # weights resident

    out = pl.pallas_call(
        mlp_kernel,
        out_shape=jax.ShapeDtypeStruct((b_pad, OUT_FEATURES), jnp.float32),
        grid=(grid_n,),
        in_specs=[
            pl.BlockSpec((tb, IN_FEATURES), lambda i: (i, 0)),    # x tile, double-buffered
            const((IN_FEATURES, HIDDEN)),
            const((1, HIDDEN)),
            const((HIDDEN, OUT_FEATURES)),
            const((1, OUT_FEATURES)),
        ],
        out_specs=pl.BlockSpec((tb, OUT_FEATURES), lambda i: (i, 0)),
        compiler_params=pltpu.CompilerParams(
            dimension_semantics=("parallel",),       # batch axis -> TC sharding
            vmem_limit_bytes=32 * 1024 * 1024,       # safe on v5e/v6e/v7x
        ),
    )(xp, w1.astype(jnp.float32), b1c, w2.astype(jnp.float32), b2c)

    return out if b_pad == B else out[:B]             # (B, OUT_FEATURES) f32


def init_params(key):
    """PyTorch-style uniform(-1/sqrt(fan_in), +1/sqrt(fan_in)) init."""
    k1, k2, k3, k4 = jax.random.split(key, 4)
    bound1 = 1.0 / (IN_FEATURES ** 0.5)
    bound2 = 1.0 / (HIDDEN ** 0.5)
    w1 = jax.random.uniform(k1, (IN_FEATURES, HIDDEN), jnp.float32, -bound1, bound1)
    b1 = jax.random.uniform(k2, (HIDDEN,), jnp.float32, -bound1, bound1)
    w2 = jax.random.uniform(k3, (HIDDEN, OUT_FEATURES), jnp.float32, -bound2, bound2)
    b2 = jax.random.uniform(k4, (OUT_FEATURES,), jnp.float32, -bound2, bound2)
    return w1, b1, w2, b2


if __name__ == "__main__":
    key = jax.random.PRNGKey(0)
    k_param, k_x = jax.random.split(key)
    w1, b1, w2, b2 = init_params(k_param)

    B = 8  # small demo batch of observations, each (num_agents + 1) * 2 = 12 wide
    x = jax.random.normal(k_x, (B, IN_FEATURES), jnp.float32)

    # TODO(synk): Network.act's argmax/.item() is host-side control flow, kept out of the kernel.
    out = network_forward(x, w1, b1, w2, b2)
    out = jax.block_until_ready(out)
    assert out.shape == (B, OUT_FEATURES)

    # Exact f32 reference (same math/precision as the kernel).
    ref = jnp.tanh(x @ w1 + b1) @ w2 + b2
    assert jnp.allclose(out, ref, atol=1e-4, rtol=1e-4), \
        float(jnp.max(jnp.abs(out - ref)))

    print("KERNEL_OK")
</pallas_src>

<mosaic_0001>
module attributes {stable_mosaic.version = 11 : i64} {
  func.func @mlp_kernel(%arg0: i32, %arg1: memref<128x12xf32, #tpu.memory_space<vmem>>, %arg2: memref<12x64xf32, #tpu.memory_space<vmem>>, %arg3: memref<1x64xf32, #tpu.memory_space<vmem>>, %arg4: memref<64x5xf32, #tpu.memory_space<vmem>>, %arg5: memref<1x5xf32, #tpu.memory_space<vmem>>, %arg6: memref<128x5xf32, #tpu.memory_space<vmem>>) attributes {dimension_semantics = [#tpu.dimension_semantics<parallel>], iteration_bounds = array<i64: 1>, scalar_prefetch = 0 : i64, scratch_operands = 0 : i64, tpu.core_type = #tpu.core_type<tc>, window_params = [{transform_indices = @transform_0, window_bounds = array<i64: 128, 12>}, {pipeline_mode = #tpu.pipeline_mode<synchronous>, transform_indices = @transform_1, window_bounds = array<i64: 12, 64>}, {pipeline_mode = #tpu.pipeline_mode<synchronous>, transform_indices = @transform_2, window_bounds = array<i64: 1, 64>}, {pipeline_mode = #tpu.pipeline_mode<synchronous>, transform_indices = @transform_3, window_bounds = array<i64: 64, 5>}, {pipeline_mode = #tpu.pipeline_mode<synchronous>, transform_indices = @transform_4, window_bounds = array<i64: 1, 5>}, {transform_indices = @transform_5, window_bounds = array<i64: 128, 5>}]} {
    %c0 = arith.constant 0 : index
    %c0_0 = arith.constant 0 : index
    %0 = vector.load %arg1[%c0, %c0_0] : memref<128x12xf32, #tpu.memory_space<vmem>>, vector<128x12xf32>
    %c0_1 = arith.constant 0 : index
    %c0_2 = arith.constant 0 : index
    %1 = vector.load %arg2[%c0_1, %c0_2] : memref<12x64xf32, #tpu.memory_space<vmem>>, vector<12x64xf32>
    %cst = arith.constant dense<0.000000e+00> : vector<128x64xf32>
    %2 = tpu.matmul %0, %1, %cst {dimension_numbers = #tpu.dot_dimension_numbers<[1], [0], [0], [1], [0, 0, 1, 1], [], []>} : vector<128x12xf32>, vector<12x64xf32>, vector<128x64xf32> -> vector<128x64xf32>
    %c0_3 = arith.constant 0 : index
    %c0_4 = arith.constant 0 : index
    %3 = vector.load %arg3[%c0_3, %c0_4] : memref<1x64xf32, #tpu.memory_space<vmem>>, vector<1x64xf32>
    %4 = vector.broadcast %3 : vector<1x64xf32> to vector<128x64xf32>
    %5 = arith.addf %2, %4 : vector<128x64xf32>
    %6 = math.tanh %5 : vector<128x64xf32>
    %c0_5 = arith.constant 0 : index
    %c0_6 = arith.constant 0 : index
    %7 = vector.load %arg4[%c0_5, %c0_6] : memref<64x5xf32, #tpu.memory_space<vmem>>, vector<64x5xf32>
    %cst_7 = arith.constant dense<0.000000e+00> : vector<128x5xf32>
    %8 = tpu.matmul %6, %7, %cst_7 {dimension_numbers = #tpu.dot_dimension_numbers<[1], [0], [0], [1], [0, 0, 1, 1], [], []>} : vector<128x64xf32>, vector<64x5xf32>, vector<128x5xf32> -> vector<128x5xf32>
    %c0_8 = arith.constant 0 : index
    %c0_9 = arith.constant 0 : index
    %9 = vector.load %arg5[%c0_8, %c0_9] : memref<1x5xf32, #tpu.memory_space<vmem>>, vector<1x5xf32>
    %10 = vector.broadcast %9 : vector<1x5xf32> to vector<128x5xf32>
    %11 = arith.addf %8, %10 : vector<128x5xf32>
    %c0_10 = arith.constant 0 : index
    %c0_11 = arith.constant 0 : index
    %12 = vector.load %arg6[%c0_10, %c0_11] : memref<128x5xf32, #tpu.memory_space<vmem>>, vector<128x5xf32>
    tpu.vector_store %arg6[%c0_10, %c0_11], %11 {strides = array<i32>} : memref<128x5xf32, #tpu.memory_space<vmem>>, vector<128x5xf32>,
    return
  }
  func.func @transform_0(%arg0: i32) -> (i32, i32) {
    %c0_i32 = arith.constant 0 : i32
    %c0_i32_0 = arith.constant 0 : i32
    return %arg0, %c0_i32 : i32, i32
  }
  func.func @transform_1(%arg0: i32) -> (i32, i32) {
    %c0_i32 = arith.constant 0 : i32
    %c0_i32_0 = arith.constant 0 : i32
    %c0_i32_1 = arith.constant 0 : i32
    return %c0_i32, %c0_i32_0 : i32, i32
  }
  func.func @transform_2(%arg0: i32) -> (i32, i32) {
    %c0_i32 = arith.constant 0 : i32
    %c0_i32_0 = arith.constant 0 : i32
    %c0_i32_1 = arith.constant 0 : i32
    return %c0_i32, %c0_i32_0 : i32, i32
  }
  func.func @transform_3(%arg0: i32) -> (i32, i32) {
    %c0_i32 = arith.constant 0 : i32
    %c0_i32_0 = arith.constant 0 : i32
    %c0_i32_1 = arith.constant 0 : i32
    return %c0_i32, %c0_i32_0 : i32, i32
  }
  func.func @transform_4(%arg0: i32) -> (i32, i32) {
    %c0_i32 = arith.constant 0 : i32
    %c0_i32_0 = arith.constant 0 : i32
    %c0_i32_1 = arith.constant 0 : i32
    return %c0_i32, %c0_i32_0 : i32, i32
  }
  func.func @transform_5(%arg0: i32) -> (i32, i32) {
    %c0_i32 = arith.constant 0 : i32
    %c0_i32_0 = arith.constant 0 : i32
    return %arg0, %c0_i32 : i32, i32
  }
}

</mosaic_0001>

<bundles_post_ra>
// kernel: network_forward.1
= control target key start
LH: loop header
LB: loop body
LE: loop exit
PB: predicated region body
PF: predicated region fallthrough
CT: control target
= control target key end

     0   :  { %vm91_vm0 = vcmask 1043456   ;;  %vm42_vm1 = vcmask 97280   ;;  %vm188_vm2 = vcmask 523264   ;;  %vm302_vm3 = vcmask 39936   ;;  %s628_s1 = inlined_call_operand.vmem [shape: f32[12,64], index: 1, kind: input, shape index: {}]   ;;  %s629_s0 = inlined_call_operand.vmem [shape: f32[128,12], index: 0, kind: input, shape index: {}]   ;;  %s630_s2 = inlined_call_operand.vmem [shape: f32[1,64], index: 2, kind: input, shape index: {}]   ;;  %s631_s3 = inlined_call_operand.vmem [shape: f32[64,5], index: 3, kind: input, shape index: {}]   ;;  %s632_s4 = inlined_call_operand.vmem [shape: f32[1,5], index: 4, kind: input, shape index: {}]   ;;  %s633_s5 = inlined_call_operand.vmem [shape: f32[128,5], index: 5, kind: output, shape index: {}]  }
   0x1   :  { %v37_v0 = vld [vmem:[%s628_s1 + $0x8] sm:$0xf]  ;;  %v36_v1 = vld [vmem:[%s628_s1] sm:$0xff]  ;;  %v22_v4 = vld [vmem:[%s629_s0 + $0x10] sm:$0xff] }
   0x2   :  { %323 = vmatpush.msk.msra.mxu0 %vm91_vm0, %v37_v0  ;;  %v20_v2 = vld [vmem:[%s629_s0] sm:$0xff]  ;;  %356 = vmatpush.msk.msra.mxu3 %vm91_vm0, %v37_v0  ;;  %v21_v3 = vld [vmem:[%s629_s0 + $0x8] sm:$0xff]  ;;  %v23_v5 = vld [vmem:[%s629_s0 + $0x18] sm:$0xff] }
   0x3   :  { %v24_v6 = vld [vmem:[%s629_s0 + $0x20] sm:$0xff]  ;;  %v29_v7 = vld [vmem:[%s629_s0 + $0x48] sm:$0xff]  ;;  %v30_v9 = vld [vmem:[%s629_s0 + $0x50] sm:$0xff] }
   0x4   :  { %110 = vmatpush.msra.mxu0 %v36_v1  ;;  %357 = vmatpush.msra.mxu3 %v36_v1  ;;  %v25_v8 = vld [vmem:[%s629_s0 + $0x28] sm:$0xff]  ;;  %v26_v10 = vld [vmem:[%s629_s0 + $0x30] sm:$0xff]  ;;  %v31_v11 = vld [vmem:[%s629_s0 + $0x58] sm:$0xff] }
   0x5   :  { %324 = vmatmul.msk.f32.vlgmr.msra.gmra.mxu0 %vm42_vm1, %v20_v2  ;;  %333 = vmatmul.msk.f32.vlgmr.msra.gmra.mxu3 %vm42_vm1, %v29_v7  ;;  %v183_v12 = vld [vmem:[%s631_s3 + $0x38] sm:$0xff]  ;;  %v182_v13 = vld [vmem:[%s631_s3 + $0x30] sm:$0xff]  ;;  %v181_v14 = vld [vmem:[%s631_s3 + $0x28] sm:$0xff] }
   0x6   :  { %245 = vmatpush.msra.mxu1 %v183_v12  ;;  %358 = vmatpush.msra.mxu2 %v183_v12  ;;  %v27_v15 = vld [vmem:[%s629_s0 + $0x38] sm:$0xff]  ;;  %v32_v16 = vld [vmem:[%s629_s0 + $0x60] sm:$0xff]  ;;  %v33_v18 = vld [vmem:[%s629_s0 + $0x68] sm:$0xff] }
   0x7   :  { %v28_v17 = vld [vmem:[%s629_s0 + $0x40] sm:$0xff]  ;;  %v34_v19 = vld [vmem:[%s629_s0 + $0x70] sm:$0xff]  ;;  %v35_v20 = vld [vmem:[%s629_s0 + $0x78] sm:$0xff] }
   0x8   :  { %246 = vmatpush.msra.mxu1 %v182_v13  ;;  %359 = vmatpush.msra.mxu2 %v182_v13  ;;  %v180_v21 = vld [vmem:[%s631_s3 + $0x20] sm:$0xff]  ;;  %v179_v22 = vld [vmem:[%s631_s3 + $0x18] sm:$0xff]  ;;  %v178_v23 = vld [vmem:[%s631_s3 + $0x10] sm:$0xff] }
   0x9   :  { %v177_v24 = vld [vmem:[%s631_s3 + $0x8] sm:$0xff]  ;;  %v176_v25 = vld [vmem:[%s631_s3] sm:$0xff] }
   0xa   :  { %247 = vmatpush.msra.mxu1 %v181_v14  ;;  %360 = vmatpush.msra.mxu2 %v181_v14  ;;  %v527_v26 = vld [vmem:[%s630_s2] ss:$0 sm:$0xff] }
   0xc   :  { %248 = vmatpush.msra.mxu1 %v180_v21  ;;  %361 = vmatpush.msra.mxu2 %v180_v21 }
   0xd   :  { %325 = vmatmul.msk.f32.gmra.mxu0 %vm42_vm1, %v21_v3  ;;  %334 = vmatmul.msk.f32.gmra.mxu3 %vm42_vm1, %v30_v9 }
   0xe   :  { %249 = vmatpush.msra.mxu1 %v179_v22  ;;  %362 = vmatpush.msra.mxu2 %v179_v22 }
  0x10   :  { %250 = vmatpush.msra.mxu1 %v178_v23  ;;  %363 = vmatpush.msra.mxu2 %v178_v23 }
  0x12   :  { %251 = vmatpush.msra.mxu1 %v177_v24  ;;  %364 = vmatpush.msra.mxu2 %v177_v24 }
  0x14   :  { %252 = vmatpush.msra.mxu1 %v176_v25  ;;  %365 = vmatpush.msra.mxu2 %v176_v25 }
  0x15   :  { %326 = vmatmul.msk.f32.gmra.mxu0 %vm42_vm1, %v22_v4  ;;  %335 = vmatmul.msk.f32.gmra.mxu3 %vm42_vm1, %v31_v11  ;;  %v367_v11 = vld [vmem:[%s632_s4] ss:$0 sm:$0xff] }
  0x1d   :  { %327 = vmatmul.msk.f32.gmra.mxu0 %vm42_vm1, %v23_v5  ;;  %336 = vmatmul.msk.f32.gmra.mxu3 %vm42_vm1, %v32_v16 }
  0x25   :  { %328 = vmatmul.msk.f32.gmra.mxu0 %vm42_vm1, %v24_v6  ;;  %337 = vmatmul.msk.f32.gmra.mxu3 %vm42_vm1, %v33_v18 }
  0x2d   :  { %329 = vmatmul.msk.f32.gmra.mxu0 %vm42_vm1, %v25_v8  ;;  %338 = vmatmul.msk.f32.gmra.mxu3 %vm42_vm1, %v34_v19 }
  0x35   :  { %330 = vmatmul.msk.f32.gmra.mxu0 %vm42_vm1, %v26_v10  ;;  %339 = vmatmul.msk.f32.gmra.mxu3 %vm42_vm1, %v35_v20 }
  0x3d   :  { %331 = vmatmul.msk.f32.gmra.mxu0 %vm42_vm1, %v27_v15 }
  0x45   :  { %332 = vmatmul.msk.f32.gmra.mxu0 %vm42_vm1, %v28_v17 }
  0x82   :  { %v112_v27 = vpop.f32.mrf.mxu0 }
  0x83   :  { %v113_v28 = vadd.f32 %v527_v26, %v112_v27 }
  0x85   :  { %368 = vtanh.f32 %v113_v28 }
  0x88   :  { %v139_v47 = vpop.f32.mrf.mxu3 }
  0x89   :  { %v140_v55 = vadd.f32 %v527_v26, %v139_v47 }
  0x8a   :  { %v115_v29 = vpop.f32.mrf.mxu0 }
  0x8b   :  { %v369_v30 = vpop.eup %368  ;;  %v116_v31 = vadd.f32 %v527_v26, %v115_v29 }
  0x8c   :  { %340 = vmatmul.msk.f32.vlgmr.msra.gmra.mxu1 %vm188_vm2, %v369_v30 }
  0x8d   :  { %370 = vtanh.f32 %v116_v31 }
  0x90   :  { %v142_v52 = vpop.f32.mrf.mxu3 }
  0x91   :  { %v143_v58 = vadd.f32 %v527_v26, %v142_v52 }
  0x92   :  { %v118_v32 = vpop.f32.mrf.mxu0 }
  0x93   :  { %v371_v33 = vpop.eup %370  ;;  %v119_v34 = vadd.f32 %v527_v26, %v118_v32 }
  0x94   :  { %341 = vmatmul.msk.f32.gmra.mxu1 %vm188_vm2, %v371_v33 }
  0x95   :  { %372 = vtanh.f32 %v119_v34 }
  0x98   :  { %v145_v57 = vpop.f32.mrf.mxu3 }
  0x99   :  { %v146_v61 = vadd.f32 %v527_v26, %v145_v57 }
  0x9a   :  { %v121_v35 = vpop.f32.mrf.mxu0 }
  0x9b   :  { %v373_v36 = vpop.eup %372  ;;  %v122_v37 = vadd.f32 %v527_v26, %v121_v35 }
  0x9c   :  { %342 = vmatmul.msk.f32.gmra.mxu1 %vm188_vm2, %v373_v36 }
  0x9d   :  { %374 = vtanh.f32 %v122_v37 }
  0xa0   :  { %v148_v60 = vpop.f32.mrf.mxu3 }
  0xa1   :  { %v149_v63 = vadd.f32 %v527_v26, %v148_v60 }
  0xa2   :  { %v124_v38 = vpop.f32.mrf.mxu0 }
  0xa3   :  { %v375_v39 = vpop.eup %374  ;;  %v125_v40 = vadd.f32 %v527_v26, %v124_v38 }
  0xa4   :  { %343 = vmatmul.msk.f32.gmra.mxu1 %vm188_vm2, %v375_v39 }
  0xa5   :  { %376 = vtanh.f32 %v125_v40 }
  0xa8   :  { %v151_v0 = vpop.f32.mrf.mxu3 }
  0xa9   :  { %v152_v2 = vadd.f32 %v527_v26, %v151_v0 }
  0xaa   :  { %v127_v41 = vpop.f32.mrf.mxu0 }
  0xab   :  { %v377_v42 = vpop.eup %376  ;;  %v128_v43 = vadd.f32 %v527_v26, %v127_v41 }
  0xac   :  { %344 = vmatmul.msk.f32.gmra.mxu1 %vm188_vm2, %v377_v42 }
  0xad   :  { %378 = vtanh.f32 %v128_v43 }
  0xb0   :  { %v154_v4 = vpop.f32.mrf.mxu3 }
  0xb1   :  { %v155_v5 = vadd.f32 %v527_v26, %v154_v4 }
  0xb2   :  { %v130_v44 = vpop.f32.mrf.mxu0 }
  0xb3   :  { %v379_v45 = vpop.eup %378  ;;  %v131_v46 = vadd.f32 %v527_v26, %v130_v44 }
  0xb4   :  { %345 = vmatmul.msk.f32.gmra.mxu1 %vm188_vm2, %v379_v45 }
  0xb5   :  { %380 = vtanh.f32 %v131_v46 }
  0xb8   :  { %v157_v7 = vpop.f32.mrf.mxu3 }
  0xb9   :  { %v158_v8 = vadd.f32 %v527_v26, %v157_v7 }
  0xba   :  { %v133_v48 = vpop.f32.mrf.mxu0 }
  0xbb   :  { %v381_v49 = vpop.eup %380  ;;  %v134_v50 = vadd.f32 %v527_v26, %v133_v48 }
  0xbc   :  { %346 = vmatmul.msk.f32.gmra.mxu1 %vm188_vm2, %v381_v49 }
  0xbd   :  { %382 = vtanh.f32 %v134_v50 }
  0xc2   :  { %v136_v51 = vpop.f32.mrf.mxu0 }
  0xc3   :  { %v383_v53 = vpop.eup %382  ;;  %v137_v54 = vadd.f32 %v527_v26, %v136_v51 }
  0xc4   :  { %347 = vmatmul.msk.f32.gmra.mxu1 %vm188_vm2, %v383_v53 }
  0xc5   :  { %384 = vtanh.f32 %v137_v54 }
  0xc6   :  { %386 = vtanh.f32 %v140_v55 }
  0xc7   :  { %388 = vtanh.f32 %v143_v58 }
  0xc8   :  { %390 = vtanh.f32 %v146_v61 }
  0xc9   :  { %392 = vtanh.f32 %v149_v63 }
  0xca   :  { %394 = vtanh.f32 %v152_v2 }
  0xcb   :  { %v385_v56 = vpop.eup %384  ;;  %396 = vtanh.f32 %v155_v5 }
  0xcc   :  { %348 = vmatmul.msk.f32.vlgmr.msra.gmra.mxu2 %vm188_vm2, %v385_v56  ;;  %v387_v59 = vpop.eup %386  ;;  %398 = vtanh.f32 %v158_v8 }
  0xcd   :  { %v389_v62 = vpop.eup %388 }
  0xce   :  { %v391_v1 = vpop.eup %390 }
  0xcf   :  { %v393_v3 = vpop.eup %392 }
  0xd0   :  { %v395_v6 = vpop.eup %394 }
  0xd1   :  { %v397_v9 = vpop.eup %396 }
  0xd2   :  { %v399_v10 = vpop.eup %398 }
  0xd4   :  { %349 = vmatmul.msk.f32.gmra.mxu2 %vm188_vm2, %v387_v59 }
  0xdc   :  { %350 = vmatmul.msk.f32.gmra.mxu2 %vm188_vm2, %v389_v62 }
  0xe4   :  { %351 = vmatmul.msk.f32.gmra.mxu2 %vm188_vm2, %v391_v1 }
  0xec   :  { %352 = vmatmul.msk.f32.gmra.mxu2 %vm188_vm2, %v393_v3 }
  0xf4   :  { %353 = vmatmul.msk.f32.gmra.mxu2 %vm188_vm2, %v395_v6 }
  0xfc   :  { %354 = vmatmul.msk.f32.gmra.mxu2 %vm188_vm2, %v397_v9 }
 0x104   :  { %355 = vmatmul.msk.f32.gmra.mxu2 %vm188_vm2, %v399_v10 }
 0x109   :  { %v254_v12 = vpop.f32.mrf.mxu1 }
 0x10a   :  { %v255_v13 = vadd.f32 %v367_v11, %v254_v12 }
 0x10c   :  { %303 = vst.msk [vmem:[%s633_s5] sm:$0xff] %vm302_vm3, %v255_v13 }
 0x111   :  { %v257_v14 = vpop.f32.mrf.mxu1 }
 0x112   :  { %v258_v15 = vadd.f32 %v367_v11, %v257_v14 }
 0x114   :  { %304 = vst.msk [vmem:[%s633_s5 + $0x8] sm:$0xff] %vm302_vm3, %v258_v15 }
 0x119   :  { %v260_v16 = vpop.f32.mrf.mxu1 }
 0x11a   :  { %v261_v17 = vadd.f32 %v367_v11, %v260_v16 }
 0x11c   :  { %305 = vst.msk [vmem:[%s633_s5 + $0x10] sm:$0xff] %vm302_vm3, %v261_v17 }
 0x121   :  { %v263_v18 = vpop.f32.mrf.mxu1 }
 0x122   :  { %v264_v19 = vadd.f32 %v367_v11, %v263_v18 }
 0x124   :  { %306 = vst.msk [vmem:[%s633_s5 + $0x18] sm:$0xff] %vm302_vm3, %v264_v19 }
 0x129   :  { %v266_v20 = vpop.f32.mrf.mxu1 }
 0x12a   :  { %v267_v21 = vadd.f32 %v367_v11, %v266_v20 }
 0x12c   :  { %307 = vst.msk [vmem:[%s633_s5 + $0x20] sm:$0xff] %vm302_vm3, %v267_v21 }
 0x131   :  { %v269_v22 = vpop.f32.mrf.mxu1 }
 0x132   :  { %v270_v23 = vadd.f32 %v367_v11, %v269_v22 }
 0x134   :  { %308 = vst.msk [vmem:[%s633_s5 + $0x28] sm:$0xff] %vm302_vm3, %v270_v23 }
 0x139   :  { %v272_v24 = vpop.f32.mrf.mxu1 }
 0x13a   :  { %v273_v25 = vadd.f32 %v367_v11, %v272_v24 }
 0x13c   :  { %309 = vst.msk [vmem:[%s633_s5 + $0x30] sm:$0xff] %vm302_vm3, %v273_v25 }
 0x141   :  { %v275_v26 = vpop.f32.mrf.mxu1 }
 0x142   :  { %v276_v27 = vadd.f32 %v367_v11, %v275_v26 }
 0x144   :  { %310 = vst.msk [vmem:[%s633_s5 + $0x38] sm:$0xff] %vm302_vm3, %v276_v27 }
 0x14f   :  { %v278_v28 = vpop.f32.mrf.mxu2 }
 0x150   :  { %v279_v29 = vadd.f32 %v367_v11, %v278_v28 }
 0x152   :  { %311 = vst.msk [vmem:[%s633_s5 + $0x40] sm:$0xff] %vm302_vm3, %v279_v29 }
 0x157   :  { %v281_v30 = vpop.f32.mrf.mxu2 }
 0x158   :  { %v282_v31 = vadd.f32 %v367_v11, %v281_v30 }
 0x15a   :  { %312 = vst.msk [vmem:[%s633_s5 + $0x48] sm:$0xff] %vm302_vm3, %v282_v31 }
 0x15f   :  { %v284_v32 = vpop.f32.mrf.mxu2 }
 0x160   :  { %v285_v33 = vadd.f32 %v367_v11, %v284_v32 }
 0x162   :  { %313 = vst.msk [vmem:[%s633_s5 + $0x50] sm:$0xff] %vm302_vm3, %v285_v33 }
 0x167   :  { %v287_v34 = vpop.f32.mrf.mxu2 }
 0x168   :  { %v288_v35 = vadd.f32 %v367_v11, %v287_v34 }
 0x16a   :  { %314 = vst.msk [vmem:[%s633_s5 + $0x58] sm:$0xff] %vm302_vm3, %v288_v35 }
 0x16f   :  { %v290_v36 = vpop.f32.mrf.mxu2 }
 0x170   :  { %v291_v37 = vadd.f32 %v367_v11, %v290_v36 }
 0x172   :  { %315 = vst.msk [vmem:[%s633_s5 + $0x60] sm:$0xff] %vm302_vm3, %v291_v37 }
 0x177   :  { %v293_v38 = vpop.f32.mrf.mxu2 }
 0x178   :  { %v294_v39 = vadd.f32 %v367_v11, %v293_v38 }
 0x17a   :  { %316 = vst.msk [vmem:[%s633_s5 + $0x68] sm:$0xff] %vm302_vm3, %v294_v39 }
 0x17f   :  { %v296_v40 = vpop.f32.mrf.mxu2 }
 0x180   :  { %v297_v41 = vadd.f32 %v367_v11, %v296_v40 }
 0x182   :  { %317 = vst.msk [vmem:[%s633_s5 + $0x70] sm:$0xff] %vm302_vm3, %v297_v41 }
 0x187   :  { %v299_v42 = vpop.f32.mrf.mxu2 }
 0x188   :  { %v300_v43 = vadd.f32 %v367_v11, %v299_v42 }
 0x18a   :  { %318 = vst.msk [vmem:[%s633_s5 + $0x78] sm:$0xff] %vm302_vm3, %v300_v43 }

</bundles_post_ra>
